<compile_context>
chip_gen: v6e
topology: v6e:2x2x1
jax: 0.10.0
libtpu: 0.0.40
codegen_flags: <defaults>
</compile_context>

<pallas_src>
import jax
import jax.numpy as jnp
from jax.experimental import pallas as pl
from jax.experimental.pallas import tpu as pltpu


def _round_up(x, m):
    return ((x + m - 1) // m) * m


def lstm_cell_kernel(z_ref, w_ref, b_ref, cx_ref, hy_ref, cy_ref):
    """One (batch-tile, hidden-tile) program.

    z_ref : [tb, K]     bf16  concat(x, hx)
    w_ref : [K, 4*tn]   bf16  gate-interleaved weights for this hidden tile
    b_ref : [1, 4*tn]   f32   fused bias (bx + bh), same interleaving
    cx_ref: [tb, tn]    f32   previous cell state tile
    hy_ref, cy_ref : [tb, tn] outputs
    """
    tn = hy_ref.shape[-1]
    # Single MXU matmul for all four gates of this hidden tile (f32 accumulate).
    gates = jnp.dot(z_ref[...], w_ref[...], preferred_element_type=jnp.float32)
    gates = gates + b_ref[...]

    # Gate slices are lane-aligned: tn is a multiple of 128.
    ingate     = jax.nn.sigmoid(gates[:, 0 * tn:1 * tn])
    forgetgate = jax.nn.sigmoid(gates[:, 1 * tn:2 * tn])
    cellgate   = jnp.tanh(gates[:, 2 * tn:3 * tn])
    outgate    = jax.nn.sigmoid(gates[:, 3 * tn:4 * tn])

    cx = cx_ref[...].astype(jnp.float32)
    cy = cx * forgetgate + ingate * cellgate
    hy = outgate * jnp.tanh(cy)

    hy_ref[...] = hy.astype(hy_ref.dtype)
    cy_ref[...] = cy.astype(cy_ref.dtype)


def lstm_cell(x, hx, cx, wx_t, wh_t, bx, bh, *,
              tb=256, tn=512, compute_dtype=jnp.bfloat16,
              vmem_limit_bytes=None):
    """LSTMCell forward. wx_t/wh_t are transposed PyTorch Linear weights
    ([in, 4H]); bx/bh are [1, 4H]. Returns (hy, cy), each [B, H].

    Note: the (padded) cx buffer is donated to cy via input_output_aliases.
    """
    B, Kin = x.shape
    H = hx.shape[-1]
    K = Kin + H
    out_dtype = x.dtype

    # Tile sizes: tb multiple of 8 (sublanes), tn multiple of 128 (lanes),
    # clamped to the (padded) problem size.
    tb = max(8, (min(tb, _round_up(B, 8)) // 8) * 8)
    tn = max(128, (min(tn, _round_up(H, 128)) // 128) * 128)
    B_pad = _round_up(B, tb)
    H_pad = _round_up(H, tn)
    K_pad = _round_up(K, 128)
    n_tiles = H_pad // tn

    # ---- one-time layout plumbing (all outside the kernel) -----------------
    # Fused activations z = [x | hx], zero-padded, bf16 for the MXU.
    z = jnp.concatenate([x, hx], axis=1).astype(compute_dtype)
    z = jnp.pad(z, ((0, B_pad - B), (0, K_pad - K)))

    # Stacked, gate-interleaved weights:
    # [K, 4H] -> [K_pad, 4, H_pad] -> [K_pad, nt, 4, tn] -> [K_pad, 4*H_pad].
    w = jnp.concatenate([wx_t, wh_t], axis=0).reshape(K, 4, H)
    w = jnp.pad(w, ((0, K_pad - K), (0, 0), (0, H_pad - H)))
    w = (w.reshape(K_pad, 4, n_tiles, tn)
          .transpose(0, 2, 1, 3)
          .reshape(K_pad, 4 * H_pad)
          .astype(compute_dtype))

    # Fused bias with the same per-tile gate interleaving, kept in f32.
    b = (bx + bh).astype(jnp.float32).reshape(4, H)
    b = jnp.pad(b, ((0, 0), (0, H_pad - H)))
    b = (b.reshape(4, n_tiles, tn)
          .transpose(1, 0, 2)
          .reshape(1, 4 * H_pad))

    cx_p = jnp.pad(cx.astype(out_dtype), ((0, B_pad - B), (0, H_pad - H)))

    grid = (B_pad // tb, H_pad // tn)

    in_itemsize = jnp.dtype(compute_dtype).itemsize
    out_itemsize = jnp.dtype(out_dtype).itemsize
    cost = pl.CostEstimate(
        flops=2 * B_pad * K_pad * 4 * H_pad,
        transcendentals=5 * B_pad * H_pad,
        bytes_accessed=(z.size * in_itemsize + w.size * in_itemsize
                        + b.size * 4 + cx_p.size * out_itemsize
                        + 2 * B_pad * H_pad * out_itemsize),
    )

    cp_kwargs = dict(dimension_semantics=("parallel", "parallel"))
    if vmem_limit_bytes is not None:
        cp_kwargs["vmem_limit_bytes"] = vmem_limit_bytes

    hy_p, cy_p = pl.pallas_call(
        lstm_cell_kernel,
        out_shape=(
            jax.ShapeDtypeStruct((B_pad, H_pad), out_dtype),
            jax.ShapeDtypeStruct((B_pad, H_pad), out_dtype),
        ),
        grid_spec=pltpu.PrefetchScalarGridSpec(
            num_scalar_prefetch=0,
            grid=grid,
            in_specs=(
                pl.BlockSpec((tb, K_pad), lambda i, j: (i, 0)),      # z
                pl.BlockSpec((K_pad, 4 * tn), lambda i, j: (0, j)),  # weights
                pl.BlockSpec((1, 4 * tn), lambda i, j: (0, j)),      # bias
                pl.BlockSpec((tb, tn), lambda i, j: (i, j)),         # cx
            ),
            out_specs=(
                pl.BlockSpec((tb, tn), lambda i, j: (i, j)),         # hy
                pl.BlockSpec((tb, tn), lambda i, j: (i, j)),         # cy
            ),
        ),
        compiler_params=pltpu.CompilerParams(**cp_kwargs),
        input_output_aliases={3: 1},   # cx buffer updated in place -> cy
        cost_estimate=cost,
    )(z, w, b, cx_p)

    return hy_p[:B, :H], cy_p[:B, :H]


def _ref_lstm_cell(x, hx, cx, wx_t, wh_t, bx, bh, mm_dtype):
    # Pure-JAX reference mirroring the PyTorch forward; mm_dtype selects the
    # matmul operand precision (f32 accumulation either way).
    gates = (
        jnp.dot(x.astype(mm_dtype), wx_t.astype(mm_dtype),
                preferred_element_type=jnp.float32)
        + jnp.dot(hx.astype(mm_dtype), wh_t.astype(mm_dtype),
                  preferred_element_type=jnp.float32)
        + bx + bh
    )
    H = hx.shape[-1]
    i = jax.nn.sigmoid(gates[:, 0 * H:1 * H])
    f = jax.nn.sigmoid(gates[:, 1 * H:2 * H])
    g = jnp.tanh(gates[:, 2 * H:3 * H])
    o = jax.nn.sigmoid(gates[:, 3 * H:4 * H])
    cy = cx * f + i * g
    hy = o * jnp.tanh(cy)
    return hy, cy


if __name__ == "__main__":
    key = jax.random.PRNGKey(0)
    B, input_size, hidden_size = 8, 16, 32
    std = float(1.0 / (hidden_size ** 0.5))

    ks = jax.random.split(key, 7)
    # Parameters initialized uniform(-std, std), matching reset_parameters().
    wx_t = jax.random.uniform(ks[0], (input_size, 4 * hidden_size),
                              jnp.float32, -std, std)
    wh_t = jax.random.uniform(ks[1], (hidden_size, 4 * hidden_size),
                              jnp.float32, -std, std)
    bx = jax.random.uniform(ks[2], (1, 4 * hidden_size), jnp.float32, -std, std)
    bh = jax.random.uniform(ks[3], (1, 4 * hidden_size), jnp.float32, -std, std)

    x = jax.random.normal(ks[4], (B, input_size), jnp.float32)
    hx = jax.random.normal(ks[5], (B, hidden_size), jnp.float32)
    cx = jax.random.normal(ks[6], (B, hidden_size), jnp.float32)

    # References computed before the kernel call (cx buffer may be donated).
    hy_f32, cy_f32 = _ref_lstm_cell(x, hx, cx, wx_t, wh_t, bx, bh, jnp.float32)
    hy_bf, cy_bf = _ref_lstm_cell(x, hx, cx, wx_t, wh_t, bx, bh, jnp.bfloat16)
    jax.block_until_ready((hy_f32, cy_f32, hy_bf, cy_bf))

    hy, cy = lstm_cell(x, hx, cx, wx_t, wh_t, bx, bh)
    jax.block_until_ready((hy, cy))

    # Exact-path check against a bf16-operand / f32-accumulate reference.
    assert jnp.allclose(hy, hy_bf, atol=1e-4, rtol=1e-4)
    assert jnp.allclose(cy, cy_bf, atol=1e-4, rtol=1e-4)
    # Semantics check against the full-f32 PyTorch-equivalent reference.
    assert jnp.allclose(hy, hy_f32, atol=3e-2, rtol=3e-2)
    assert jnp.allclose(cy, cy_f32, atol=3e-2, rtol=3e-2)

    print("KERNEL_OK")
</pallas_src>

<mosaic_0001>
module attributes {stable_mosaic.version = 11 : i64} {
  func.func @lstm_cell_kernel(%arg0: i32, %arg1: i32, %arg2: memref<8x128xbf16, #tpu.memory_space<vmem>>, %arg3: memref<128x512xbf16, #tpu.memory_space<vmem>>, %arg4: memref<1x512xf32, #tpu.memory_space<vmem>>, %arg5: memref<8x128xf32, #tpu.memory_space<vmem>>, %arg6: memref<8x128xf32, #tpu.memory_space<vmem>>, %arg7: memref<8x128xf32, #tpu.memory_space<vmem>>) attributes {dimension_semantics = [#tpu.dimension_semantics<parallel>, #tpu.dimension_semantics<parallel>], iteration_bounds = array<i64: 1, 1>, scalar_prefetch = 0 : i64, scratch_operands = 0 : i64, tpu.core_type = #tpu.core_type<tc>, window_params = [{transform_indices = @transform_0, window_bounds = array<i64: 8, 128>}, {transform_indices = @transform_1, window_bounds = array<i64: 128, 512>}, {transform_indices = @transform_2, window_bounds = array<i64: 1, 512>}, {transform_indices = @transform_3, window_bounds = array<i64: 8, 128>}, {transform_indices = @transform_4, window_bounds = array<i64: 8, 128>}, {transform_indices = @transform_5, window_bounds = array<i64: 8, 128>}]} {
    %c0 = arith.constant 0 : index
    %c0_0 = arith.constant 0 : index
    %0 = vector.load %arg2[%c0, %c0_0] : memref<8x128xbf16, #tpu.memory_space<vmem>>, vector<8x128xbf16>
    %c0_1 = arith.constant 0 : index
    %c0_2 = arith.constant 0 : index
    %1 = vector.load %arg3[%c0_1, %c0_2] : memref<128x512xbf16, #tpu.memory_space<vmem>>, vector<128x512xbf16>
    %cst = arith.constant dense<0.000000e+00> : vector<8x512xf32>
    %2 = tpu.matmul %0, %1, %cst {dimension_numbers = #tpu.dot_dimension_numbers<[1], [0], [0], [1], [0, 0, 1, 1], [], []>} : vector<8x128xbf16>, vector<128x512xbf16>, vector<8x512xf32> -> vector<8x512xf32>
    %c0_3 = arith.constant 0 : index
    %c0_4 = arith.constant 0 : index
    %3 = vector.load %arg4[%c0_3, %c0_4] : memref<1x512xf32, #tpu.memory_space<vmem>>, vector<1x512xf32>
    %4 = vector.broadcast %3 : vector<1x512xf32> to vector<8x512xf32>
    %5 = arith.addf %2, %4 : vector<8x512xf32>
    %6 = vector.extract_strided_slice %5 {offsets = [0, 0], sizes = [8, 128], strides = [1, 1]} : vector<8x512xf32> to vector<8x128xf32>
    %7 = arith.negf %6 : vector<8x128xf32>
    %8 = math.exp %7 : vector<8x128xf32>
    %cst_5 = arith.constant 1.000000e+00 : f32
    %9 = vector.broadcast %cst_5 : f32 to vector<8x128xf32>
    %10 = arith.addf %9, %8 : vector<8x128xf32>
    %11 = arith.divf %9, %10 : vector<8x128xf32>
    %12 = vector.extract_strided_slice %5 {offsets = [0, 128], sizes = [8, 128], strides = [1, 1]} : vector<8x512xf32> to vector<8x128xf32>
    %13 = arith.negf %12 : vector<8x128xf32>
    %14 = math.exp %13 : vector<8x128xf32>
    %cst_6 = arith.constant 1.000000e+00 : f32
    %15 = vector.broadcast %cst_6 : f32 to vector<8x128xf32>
    %16 = arith.addf %15, %14 : vector<8x128xf32>
    %17 = arith.divf %15, %16 : vector<8x128xf32>
    %18 = vector.extract_strided_slice %5 {offsets = [0, 256], sizes = [8, 128], strides = [1, 1]} : vector<8x512xf32> to vector<8x128xf32>
    %19 = math.tanh %18 : vector<8x128xf32>
    %20 = vector.extract_strided_slice %5 {offsets = [0, 384], sizes = [8, 128], strides = [1, 1]} : vector<8x512xf32> to vector<8x128xf32>
    %21 = arith.negf %20 : vector<8x128xf32>
    %22 = math.exp %21 : vector<8x128xf32>
    %cst_7 = arith.constant 1.000000e+00 : f32
    %23 = vector.broadcast %cst_7 : f32 to vector<8x128xf32>
    %24 = arith.addf %23, %22 : vector<8x128xf32>
    %25 = arith.divf %23, %24 : vector<8x128xf32>
    %c0_8 = arith.constant 0 : index
    %c0_9 = arith.constant 0 : index
    %26 = vector.load %arg5[%c0_8, %c0_9] : memref<8x128xf32, #tpu.memory_space<vmem>>, vector<8x128xf32>
    %27 = arith.mulf %26, %17 : vector<8x128xf32>
    %28 = arith.mulf %11, %19 : vector<8x128xf32>
    %29 = arith.addf %27, %28 : vector<8x128xf32>
    %30 = math.tanh %29 : vector<8x128xf32>
    %31 = arith.mulf %25, %30 : vector<8x128xf32>
    %c0_10 = arith.constant 0 : index
    %c0_11 = arith.constant 0 : index
    %32 = vector.load %arg6[%c0_10, %c0_11] : memref<8x128xf32, #tpu.memory_space<vmem>>, vector<8x128xf32>
    tpu.vector_store %arg6[%c0_10, %c0_11], %31 {strides = array<i32>} : memref<8x128xf32, #tpu.memory_space<vmem>>, vector<8x128xf32>,
    %c0_12 = arith.constant 0 : index
    %c0_13 = arith.constant 0 : index
    %33 = vector.load %arg7[%c0_12, %c0_13] : memref<8x128xf32, #tpu.memory_space<vmem>>, vector<8x128xf32>
    tpu.vector_store %arg7[%c0_12, %c0_13], %29 {strides = array<i32>} : memref<8x128xf32, #tpu.memory_space<vmem>>, vector<8x128xf32>,
    return
  }
  func.func @transform_0(%arg0: i32, %arg1: i32) -> (i32, i32) {
    %c0_i32 = arith.constant 0 : i32
    %c0_i32_0 = arith.constant 0 : i32
    return %arg0, %c0_i32 : i32, i32
  }
  func.func @transform_1(%arg0: i32, %arg1: i32) -> (i32, i32) {
    %c0_i32 = arith.constant 0 : i32
    %c0_i32_0 = arith.constant 0 : i32
    return %c0_i32, %arg1 : i32, i32
  }
  func.func @transform_2(%arg0: i32, %arg1: i32) -> (i32, i32) {
    %c0_i32 = arith.constant 0 : i32
    %c0_i32_0 = arith.constant 0 : i32
    return %c0_i32, %arg1 : i32, i32
  }
  func.func @transform_3(%arg0: i32, %arg1: i32) -> (i32, i32) {
    %c0_i32 = arith.constant 0 : i32
    return %arg0, %arg1 : i32, i32
  }
  func.func @transform_4(%arg0: i32, %arg1: i32) -> (i32, i32) {
    %c0_i32 = arith.constant 0 : i32
    return %arg0, %arg1 : i32, i32
  }
  func.func @transform_5(%arg0: i32, %arg1: i32) -> (i32, i32) {
    %c0_i32 = arith.constant 0 : i32
    return %arg0, %arg1 : i32, i32
  }
}

</mosaic_0001>

<bundles_post_ra>
// kernel: tpu_custom_call.1
= control target key start
LH: loop header
LB: loop body
LE: loop exit
PB: predicated region body
PF: predicated region fallthrough
CT: control target
= control target key end

     0   :  { %11 = vsyncpa [#allocation3], 0  ;;  %s651_s0 = inlined_call_operand.vmem [shape: bf16[8,128], index: 0, kind: input, shape index: {}]   ;;  %s652_s1 = inlined_call_operand.hbm [shape: bf16[128,512], index: 1, kind: input, shape index: {}]   ;;  %s653_s2 = inlined_call_operand.vmem [shape: f32[1,512], index: 2, kind: input, shape index: {}]   ;;  %s654_s3 = inlined_call_operand.hbm [shape: f32[8,128], index: 3, kind: input, shape index: {}, may-alias: {3,5}]   ;;  %s655_s4 = inlined_call_operand.hbm [shape: f32[8,128], index: 4, kind: output, shape index: {0}]   ;;  %s656_s5 = inlined_call_operand.hbm [shape: f32[8,128], index: 5, kind: output, shape index: {1}, may-alias: {3,5}]  }
   0x1   :  { %12 = vsyncpa [#allocation6], 0 }
   0x2   :  { %13 = vsyncpa [#allocation4], 0 }
   0x3   :  { %14 = vsyncpa [#allocation9], 0  ;;  %s596_s18 = smov [#allocation2]  }
   0x4   :  { %s22_s19 = sshll.u32 %s596_s18, 4  ;;  %s23_s19 = int_to_ptr.vmem [resolvable:$true] %s22_s19 }
   0x5   :  { %s516_s20 = scalar_lea.vmem %s23_s19, 4096  ;;  %p521_p1 = scmp.lt.s32.totalorder %s23_s19, %s23_s19 }
   0x6   :  { %p517_p0 = scmp.ne.s32.totalorder %s23_s19, %s516_s20  ;;  %p522_p2 = scmp.lt.s32.totalorder %s516_s20, %s516_s20 }
   0x8   :  { %p523_p3 = por %p522_p2, %p521_p1 }
   0xa   :  { %p524_p4 = pnand %p523_p3, %p517_p0 }
   0xc   :  { %527 = shalt.err (!%p524_p4)
}
   0xd   :  { %s597_s21 = smov 256   ;;  %s598_s22 = smov 16  }
   0xe   :  { %28 = dma.hbm_to_vmem [thread:$0]  %s652_s1, 4096, %s23_s19, [#allocation3], %s597_s21, %s597_s21, %s598_s22  }
   0xf   :  { %s599_s25 = smov [#allocation5]  }
  0x10   :  { %s37_s26 = sshll.u32 %s599_s25, 4  ;;  %s38_s26 = int_to_ptr.vmem [resolvable:$true] %s37_s26 }
  0x11   :  { %s536_s27 = scalar_lea.vmem %s38_s26, 128  ;;  %p541_p6 = scmp.lt.s32.totalorder %s38_s26, %s38_s26 }
  0x12   :  { %p537_p5 = scmp.ne.s32.totalorder %s38_s26, %s536_s27  ;;  %p542_p7 = scmp.lt.s32.totalorder %s536_s27, %s536_s27 }
  0x14   :  { %p543_p8 = por %p542_p7, %p541_p6 }
  0x16   :  { %p544_p9 = pnand %p543_p8, %p537_p5 }
  0x18   :  { %547 = shalt.err (!%p544_p9)
}
  0x19   :  { %40 = dma.hbm_to_vmem [thread:$0]  %s654_s3, 128, %s38_s26, [#allocation6]  }
  0x1a   :  { %588 = dma.done.wait [#allocation3], 4096  }
  0x1b   :  { %589 = vsyncadd [#allocation3], 4294963200 }
  0x1c   :  { %590 = dma.done.wait [#allocation6], 128  }
  0x1d   :  { %591 = vsyncadd [#allocation6], 4294967168  ;;  %v600_v0 = vmov 0   ;;  %v444_v1 = vld [vmem:[#allocation2 + $0xe4] ss:$16 sps:$4 sm:$0xff]   ;;  %v83_v34 = vlaneseq }
  0x1e   :  { %295 = vmatprep.mubr.bf16.mxu0 %v600_v0  ;;  %336 = vmatprep.mubr.bf16.mxu1 %v600_v0  ;;  %v446_v2 = vld [vmem:[#allocation2 + $0xe0] ss:$16 sps:$4 sm:$0xff]   ;;  %v447_v3 = vld [vmem:[#allocation2 + $0xc4] ss:$16 sps:$4 sm:$0xff]   ;;  %v455_v6 = vld [vmem:[#allocation2 + $0xec] ss:$16 sps:$4 sm:$0xff]  }
  0x1f   :  { %263 = vmatprep.subr.bf16.mxu0 %v444_v1  ;;  %v449_v4 = vld [vmem:[#allocation2 + $0xc0] ss:$16 sps:$4 sm:$0xff]   ;;  %v450_v5 = vld [vmem:[#allocation2 + $0xa4] ss:$16 sps:$4 sm:$0xff]   ;;  %v458_v7 = vld [vmem:[#allocation2 + $0xe8] ss:$16 sps:$4 sm:$0xff]   ;;  %304 = vmatprep.subr.bf16.mxu1 %v455_v6 }
  0x20   :  { %264 = vmatpush1.bf16.msra.mxu0 %v446_v2  ;;  %v452_v8 = vld [vmem:[#allocation2 + $0xa0] ss:$16 sps:$4 sm:$0xff]   ;;  %v453_v9 = vld [vmem:[#allocation2 + $0x84] ss:$16 sps:$4 sm:$0xff]   ;;  %305 = vmatpush1.bf16.msra.mxu1 %v458_v7  ;;  %v461_v10 = vld [vmem:[#allocation2 + $0xcc] ss:$16 sps:$4 sm:$0xff]  }
  0x21   :  { %265 = vmatprep.subr.bf16.mxu0 %v447_v3  ;;  %v464_v11 = vld [vmem:[#allocation2 + $0xc8] ss:$16 sps:$4 sm:$0xff]   ;;  %306 = vmatprep.subr.bf16.mxu1 %v461_v10  ;;  %v457_v12 = vld [vmem:[#allocation2 + $0x80] ss:$16 sps:$4 sm:$0xff]   ;;  %v459_v13 = vld [vmem:[#allocation2 + $0x64] ss:$16 sps:$4 sm:$0xff]  }
  0x22   :  { %v467_v14 = vld [vmem:[#allocation2 + $0xac] ss:$16 sps:$4 sm:$0xff]   ;;  %v470_v15 = vld [vmem:[#allocation2 + $0xa8] ss:$16 sps:$4 sm:$0xff]   ;;  %v463_v17 = vld [vmem:[#allocation2 + $0x60] ss:$16 sps:$4 sm:$0xff]  }
  0x23   :  { %v473_v16 = vld [vmem:[#allocation2 + $0x8c] ss:$16 sps:$4 sm:$0xff]   ;;  %v465_v18 = vld [vmem:[#allocation2 + $0x44] ss:$16 sps:$4 sm:$0xff]   ;;  %v476_v19 = vld [vmem:[#allocation2 + $0x88] ss:$16 sps:$4 sm:$0xff]  }
  0x24   :  { %266 = vmatpush1.bf16.msra.mxu0 %v449_v4  ;;  %307 = vmatpush1.bf16.msra.mxu1 %v464_v11  ;;  %v479_v20 = vld [vmem:[#allocation2 + $0x6c] ss:$16 sps:$4 sm:$0xff]   ;;  %v469_v21 = vld [vmem:[#allocation2 + $0x40] ss:$16 sps:$4 sm:$0xff]   ;;  %v471_v22 = vld [vmem:[#allocation2 + $0x24] ss:$16 sps:$4 sm:$0xff]  }
  0x25   :  { %267 = vmatprep.subr.bf16.mxu0 %v450_v5  ;;  %308 = vmatprep.subr.bf16.mxu1 %v467_v14  ;;  %v482_v23 = vld [vmem:[#allocation2 + $0x68] ss:$16 sps:$4 sm:$0xff]   ;;  %v483_v24 = vld [vmem:[#allocation2 + $0x4c] ss:$16 sps:$4 sm:$0xff]   ;;  %v475_v25 = vld [vmem:[#allocation2 + $0x20] ss:$16 sps:$4 sm:$0xff]  }
  0x26   :  { %v477_v26 = vld [vmem:[#allocation2 + $0x4] ss:$16 sps:$4 sm:$0xff]   ;;  %v485_v27 = vld [vmem:[#allocation2 + $0x48] ss:$16 sps:$4 sm:$0xff]   ;;  %v486_v28 = vld [vmem:[#allocation2 + $0x2c] ss:$16 sps:$4 sm:$0xff]  }
  0x27   :  { %v481_v29 = vld [vmem:[#allocation2] ss:$16 sps:$4 sm:$0xff]   ;;  %v488_v30 = vld [vmem:[#allocation2 + $0x28] ss:$16 sps:$4 sm:$0xff]   ;;  %v489_v31 = vld [vmem:[#allocation2 + $0xc] ss:$16 sps:$4 sm:$0xff]  }
  0x28   :  { %268 = vmatpush1.bf16.msra.mxu0 %v452_v8  ;;  %309 = vmatpush1.bf16.msra.mxu1 %v470_v15  ;;  %v48_v32 = vld [vmem:[%s651_s0] sm:$0xf]  ;;  %v491_v33 = vld [vmem:[#allocation2 + $0x8] ss:$16 sps:$4 sm:$0xff]   ;;  %v84_v35 = vshrl.u32 %v83_v34, 7  ;;  %s601_s0 = smov [#allocation8]  }
  0x29   :  { %269 = vmatprep.subr.bf16.mxu0 %v453_v9  ;;  %310 = vmatprep.subr.bf16.mxu1 %v473_v16  ;;  %v81_v37 = vld [vmem:[%s653_s2] sm:$0xf]  ;;  %s388_s2 = sshll.u32 %s601_s0, 4  ;;  %s389_s2 = int_to_ptr.vmem [resolvable:$true] %s388_s2 }
  0x2a   :  { %v85_v36 = vsub.s32 0, %v84_v35  ;;  %v89_v38 = vsub.s32 1, %v84_v35  ;;  %v97_v47 = vsub.s32 3, %v84_v35  ;;  %v93_v51 = vsub.s32 2, %v84_v35  ;;  %v364_v3 = vld [vmem:[#allocation5] sm:$0xff]  ;;  %s548_s7 = scalar_lea.vmem %s389_s2, 128  ;;  %p553_p11 = scmp.lt.s32.totalorder %s389_s2, %s389_s2 }
  0x2b   :  { %p549_p10 = scmp.ne.s32.totalorder %s389_s2, %s548_s7  ;;  %p554_p12 = scmp.lt.s32.totalorder %s548_s7, %s548_s7 }
  0x2c   :  { %270 = vmatpush1.bf16.msra.mxu0 %v457_v12  ;;  %311 = vmatpush1.bf16.msra.mxu1 %v476_v19  ;;  %v86_v39 = vrot.slane %v81_v37, %v85_v36  ;;  %v90_v40 = vrot.slane %v81_v37, %v89_v38  ;;  %v98_v53 = vrot.slane %v81_v37, %v97_v47 }
  0x2d   :  { %271 = vmatprep.subr.bf16.mxu0 %v459_v13  ;;  %312 = vmatprep.subr.bf16.mxu1 %v479_v20  ;;  %v94_v55 = vrot.slane %v81_v37, %v93_v51  ;;  %p555_p13 = por %p554_p12, %p553_p11 }
  0x2f   :  { %p556_p0 = pnand %p555_p13, %p549_p10 }
  0x30   :  { %272 = vmatpush1.bf16.msra.mxu0 %v463_v17  ;;  %313 = vmatpush1.bf16.msra.mxu1 %v482_v23 }
  0x31   :  { %273 = vmatprep.subr.bf16.mxu0 %v465_v18  ;;  %314 = vmatprep.subr.bf16.mxu1 %v483_v24 }
  0x34   :  { %274 = vmatpush1.bf16.msra.mxu0 %v469_v21  ;;  %315 = vmatpush1.bf16.msra.mxu1 %v485_v27 }
  0x35   :  { %275 = vmatprep.subr.bf16.mxu0 %v471_v22  ;;  %316 = vmatprep.subr.bf16.mxu1 %v486_v28 }
  0x38   :  { %276 = vmatpush1.bf16.msra.mxu0 %v475_v25  ;;  %317 = vmatpush1.bf16.msra.mxu1 %v488_v30 }
  0x39   :  { %277 = vmatprep.subr.bf16.mxu0 %v477_v26  ;;  %318 = vmatprep.subr.bf16.mxu1 %v489_v31 }
  0x3c   :  { %278 = vmatpush1.bf16.msra.mxu0 %v481_v29  ;;  %319 = vmatpush1.bf16.msra.mxu1 %v491_v33 }
  0x3f   :  { %296 = vmatmul.mubr.bf16.vlgmr.msra.gmra.mxu0 %v48_v32  ;;  %337 = vmatmul.mubr.bf16.vlgmr.msra.gmra.mxu1 %v48_v32 }
  0xff   :  { %v297_v41 = vpop.f32.mrf.mxu0  ;;  %v338_v49 = vpop.f32.mrf.mxu1 }
 0x100   :  { %v298_v42 = vadd.f32 %v297_v41, %v86_v39  ;;  %v339_v58 = vadd.f32 %v338_v49, %v94_v55 }
 0x101   :  { %v299_v43 = vpop.f32.mrf.mxu0  ;;  %v340_v52 = vpop.f32.mrf.mxu1 }
 0x102   :  { %v434_v44 = vmul.f32 -1.442695, %v298_v42  ;;  %v300_v45 = vadd.f32 %v299_v43, %v90_v40  ;;  %v341_v57 = vadd.f32 %v340_v52, %v98_v53 }
 0x103   :  { %v301_v46 = vpop.f32.mrf.mxu0  ;;  %v342_v54 = vpop.f32.mrf.mxu1 }
 0x104   :  { %492 = vpow2.f32 %v434_v44  ;;  %v435_v48 = vmul.f32 -1.442695, %v300_v45  ;;  %v436_v59 = vmul.f32 -1.442695, %v341_v57 }
 0x105   :  { %v302_v50 = vpop.f32.mrf.mxu0  ;;  %v343_v56 = vpop.f32.mrf.mxu1 }
 0x106   :  { %494 = vpow2.f32 %v435_v48 }
 0x107   :  { %496 = vtanh.f32 %v339_v58 }
 0x108   :  { %498 = vpow2.f32 %v436_v59 }
 0x111   :  { %v493_v60 = vpop.eup %492 }
 0x112   :  { %v348_v61 = vadd.f32 1.0, %v493_v60 }
 0x113   :  { %v495_v62 = vpop.eup %494 }
 0x114   :  { %500 = vrcp.f32 %v348_v61  ;;  %v354_v63 = vadd.f32 1.0, %v495_v62  ;;  %v497_v0 = vpop.eup %496 }
 0x115   :  { %v499_v1 = vpop.eup %498 }
 0x116   :  { %502 = vrcp.f32 %v354_v63  ;;  %v361_v5 = vadd.f32 1.0, %v499_v1 }
 0x118   :  { %504 = vrcp.f32 %v361_v5 }
 0x121   :  { %v501_v2 = vpop.eup %500 }
 0x122   :  { %v366_v7 = vmul.f32 %v501_v2, %v497_v0 }
 0x123   :  { %v503_v4 = vpop.eup %502 }
 0x124   :  { %v365_v6 = vmul.f32 %v503_v4, %v364_v3 }
 0x126   :  { %v367_v8 = vadd.f32 %v366_v7, %v365_v6 }
 0x128   :  { %371 = vst [vmem:[#allocation8] sm:$0xff] %v367_v8  ;;  %506 = vtanh.f32 %v367_v8 }
 0x129   :  { %559 = shalt.err (!%p556_p0)
}
 0x12a   :  { %391 = dma.vmem_to_hbm [thread:$0]  %s389_s2, 128, %s656_s5, [#allocation9]   ;;  %v505_v9 = vpop.eup %504 }
 0x12b   :  { %s602_s10 = smov [#allocation7]  }
 0x12c   :  { %s378_s11 = sshll.u32 %s602_s10, 4  ;;  %s379_s11 = int_to_ptr.vmem [resolvable:$true] %s378_s11 }
 0x12d   :  { %s568_s12 = scalar_lea.vmem %s379_s11, 128  ;;  %p573_p2 = scmp.lt.s32.totalorder %s379_s11, %s379_s11 }
 0x12e   :  { %p569_p1 = scmp.ne.s32.totalorder %s379_s11, %s568_s12  ;;  %p574_p3 = scmp.lt.s32.totalorder %s568_s12, %s568_s12 }
 0x130   :  { %p575_p4 = por %p574_p3, %p573_p2 }
 0x132   :  { %p576_p5 = pnand %p575_p4, %p569_p1 }
 0x135   :  { %v507_v10 = vpop.eup %506 }
 0x136   :  { %v369_v11 = vmul.f32 %v507_v10, %v505_v9 }
 0x138   :  { %370 = vst [vmem:[#allocation7] sm:$0xff] %v369_v11 }
 0x139   :  { %579 = shalt.err (!%p576_p5)
}
 0x13a   :  { %381 = dma.vmem_to_hbm [thread:$0]  %s379_s11, 128, %s655_s4, [#allocation4]  }
 0x13b   :  { %592 = dma.done.wait [#allocation4], 128  }
 0x13c   :  { %593 = vsyncadd [#allocation4], 4294967168 }
 0x13d   :  { %594 = dma.done.wait [#allocation9], 128  }
 0x13e   :  { %595 = vsyncadd [#allocation9], 4294967168 }
 0x13f   :  { %398 = vsyncpa [#allocation3], 1 }
 0x140   :  { %399 = vsyncpa [#allocation6], 1 }
 0x141   :  { %400 = vsyncpa [#allocation4], 1 }
 0x142   :  { %401 = vsyncpa [#allocation9], 1 }

</bundles_post_ra>
